<compile_context>
chip_gen: v7x
topology: tpu7x:2x2x1
jax: 0.10.0
libtpu: 0.0.40
codegen_flags: <defaults>
</compile_context>

<pallas_src>
import jax
import jax.numpy as jnp
from jax.experimental import pallas as pl
from jax.experimental.pallas import tpu as pltpu


def _lstm_gate_math(gates, c, hidden_size):
    """Shared elementwise epilogue. gates: (B, 4H) f32, c: (B, H) f32."""
    H = hidden_size
    # One full-vreg sigmoid pass covers the i/f/o bands (instead of three
    # sub-vreg passes); tanh only touches the g band and the new cell state.
    # TODO(synk): fully lane-slice-free epilogue would need a gate-on-sublane
    # (transposed) layout; at 4H=128 the slices are a single-vreg extraction.
    sig = jax.nn.sigmoid(gates)
    i_g = sig[:, 0 * H:1 * H]
    f_g = sig[:, 1 * H:2 * H]
    o_g = sig[:, 3 * H:4 * H]
    g_g = jnp.tanh(gates[:, 2 * H:3 * H])
    c_new = f_g * c + i_g * g_g
    h_new = o_g * jnp.tanh(c_new)
    return h_new, c_new


def lstm_cell_kernel(xh_ref, c_ref, w_ref, b_ref, h_out_ref, c_out_ref):
    """Single LSTMCell step: one fused MXU matmul + elementwise epilogue."""
    xh = xh_ref[...].astype(jnp.float32)
    c = c_ref[...].astype(jnp.float32)
    gates = (jnp.dot(xh, w_ref[...], preferred_element_type=jnp.float32)
             + b_ref[...])
    h_new, c_new = _lstm_gate_math(gates, c, c_ref.shape[-1])
    h_out_ref[...] = h_new.astype(h_out_ref.dtype)
    c_out_ref[...] = c_new.astype(c_out_ref.dtype)


def lstm_seq_kernel(xproj_ref, h0_ref, c0_ref, whh_ref, h_out_ref, c_out_ref):
    """One timestep of the in-kernel time loop (grid axis 0 = time).

    h/c state is carried in the resident output blocks (constant out index),
    W_hh^T stays resident in VMEM, and x_t @ W_ih^T + bias is precomputed
    outside and streamed per step via BlockSpec pipelining.
    """
    t = pl.program_id(0)

    @pl.when(t == 0)
    def _():
        h_out_ref[...] = h0_ref[...]
        c_out_ref[...] = c0_ref[...]

    h = h_out_ref[...].astype(jnp.float32)
    c = c_out_ref[...].astype(jnp.float32)
    gates = (xproj_ref[...].astype(jnp.float32)
             + jnp.dot(h, whh_ref[...], preferred_element_type=jnp.float32))
    h_new, c_new = _lstm_gate_math(gates, c, h0_ref.shape[-1])
    h_out_ref[...] = h_new.astype(h_out_ref.dtype)
    c_out_ref[...] = c_new.astype(c_out_ref.dtype)


def prepare_lstm_params(w_ih, w_hh, b_ih, b_hh):
    """Hoisted once per parameter set (layout plumbing, not per forward)."""
    w_cat = jnp.concatenate([w_ih, w_hh], axis=1).T     # (input_size + H, 4H)
    bias = (b_ih + b_hh).reshape(1, -1)                 # (1, 4H)
    return w_cat, bias


def recurrent_core_forward(features, h_prev, c_prev, gaze, prepared_params):
    """Single-step RecurrentCore.forward (== nn.LSTMCell)."""
    w_cat, bias = prepared_params
    B, H = h_prev.shape
    # Fuse cat(features, gaze) with the x|h concat feeding the single matmul.
    xh = jnp.concatenate([features, gaze, h_prev], axis=1)   # (B, input + H)
    K = xh.shape[1]

    vmem = pl.BlockSpec(memory_space=pltpu.MemorySpace.VMEM)
    cost = pl.CostEstimate(
        flops=2 * B * K * 4 * H + 10 * B * H,
        transcendentals=6 * B * H,   # sigmoid over 4H lanes + 2x tanh over H
        bytes_accessed=4 * (xh.size + c_prev.size + w_cat.size
                            + bias.size + 2 * B * H),
    )
    h_new, c_new = pl.pallas_call(
        lstm_cell_kernel,
        out_shape=(jax.ShapeDtypeStruct((B, H), h_prev.dtype),
                   jax.ShapeDtypeStruct((B, H), c_prev.dtype)),
        in_specs=[vmem, vmem, vmem, vmem],
        out_specs=(vmem, vmem),
        cost_estimate=cost,
    )(xh, c_prev, w_cat, bias)
    return h_new, c_new


def recurrent_core_forward_sequence(features_seq, h0, c0, gaze_seq,
                                    prepared_params):
    """Apply the cell over T steps inside a single pallas_call; returns final (h, c)."""
    w_cat, bias = prepared_params
    T, B, F = features_seq.shape
    H = h0.shape[-1]
    Kin = F + gaze_seq.shape[-1]

    xs = jnp.concatenate([features_seq, gaze_seq], axis=-1)   # (T, B, Kin)
    wih_t = w_cat[:Kin]                                       # (Kin, 4H)
    whh_t = w_cat[Kin:]                                       # (H, 4H)
    # Time-parallel input projection: one big XLA matmul over all T steps;
    # only the recurrent h @ W_hh^T matmul remains inside the grid loop.
    xproj = jnp.einsum('tbk,kg->tbg', xs, wih_t) + bias       # (T, B, 4H)

    h_new, c_new = pl.pallas_call(
        lstm_seq_kernel,
        out_shape=(jax.ShapeDtypeStruct((B, H), h0.dtype),
                   jax.ShapeDtypeStruct((B, H), c0.dtype)),
        grid_spec=pltpu.PrefetchScalarGridSpec(
            num_scalar_prefetch=0,
            grid=(T,),
            in_specs=[
                pl.BlockSpec((None, B, 4 * H), lambda t: (t, 0, 0)),  # x_t streamed
                pl.BlockSpec((B, H), lambda t: (0, 0)),               # h0 resident
                pl.BlockSpec((B, H), lambda t: (0, 0)),               # c0 resident
                pl.BlockSpec((H, 4 * H), lambda t: (0, 0)),           # W_hh^T resident
            ],
            out_specs=(pl.BlockSpec((B, H), lambda t: (0, 0)),        # h state
                       pl.BlockSpec((B, H), lambda t: (0, 0))),       # c state
        ),
        compiler_params=pltpu.CompilerParams(
            dimension_semantics=("arbitrary",)),
    )(xproj, h0, c0, whh_t)
    return h_new, c_new


def _lstm_cell_reference(x, h, c, w_ih, w_hh, b_ih, b_hh):
    gates = x @ w_ih.T + b_ih + h @ w_hh.T + b_hh
    H = h.shape[-1]
    i_g = jax.nn.sigmoid(gates[:, 0 * H:1 * H])
    f_g = jax.nn.sigmoid(gates[:, 1 * H:2 * H])
    g_g = jnp.tanh(gates[:, 2 * H:3 * H])
    o_g = jax.nn.sigmoid(gates[:, 3 * H:4 * H])
    c_new = f_g * c + i_g * g_g
    h_new = o_g * jnp.tanh(c_new)
    return h_new, c_new


if __name__ == "__main__":
    B = 4            # batch
    F = 28           # feature dim
    G = 4            # gaze dim
    INPUT_SIZE = F + G
    H = 32           # hidden_size
    T = 8            # timesteps for the sequence fast path

    key = jax.random.PRNGKey(0)
    kf, kg, kh, kc, k1, k2, k3, k4, kfs, kgs = jax.random.split(key, 10)

    features = jax.random.normal(kf, (B, F), dtype=jnp.float32)
    gaze = jax.random.normal(kg, (B, G), dtype=jnp.float32)
    h_prev = jax.random.normal(kh, (B, H), dtype=jnp.float32)
    c_prev = jax.random.normal(kc, (B, H), dtype=jnp.float32)

    # nn.LSTMCell-shaped params: W_ih (4H, in), W_hh (4H, H), b_ih/b_hh (4H,).
    bound = 1.0 / (H ** 0.5)
    w_ih = jax.random.uniform(k1, (4 * H, INPUT_SIZE), jnp.float32, -bound, bound)
    w_hh = jax.random.uniform(k2, (4 * H, H), jnp.float32, -bound, bound)
    b_ih = jax.random.uniform(k3, (4 * H,), jnp.float32, -bound, bound)
    b_hh = jax.random.uniform(k4, (4 * H,), jnp.float32, -bound, bound)

    prepared = prepare_lstm_params(w_ih, w_hh, b_ih, b_hh)   # hoisted, done once

    # --- single-step forward (matches RecurrentCore.forward) ---
    h_new, c_new = recurrent_core_forward(features, h_prev, c_prev, gaze, prepared)
    jax.block_until_ready((h_new, c_new))

    x = jnp.concatenate([features, gaze], axis=1)
    h_ref, c_ref = _lstm_cell_reference(x, h_prev, c_prev, w_ih, w_hh, b_ih, b_hh)
    assert jnp.allclose(h_new, h_ref, atol=1e-5, rtol=1e-5)
    assert jnp.allclose(c_new, c_ref, atol=1e-5, rtol=1e-5)

    # --- multi-step fast path: whole time loop inside ONE pallas_call ---
    features_seq = jax.random.normal(kfs, (T, B, F), dtype=jnp.float32)
    gaze_seq = jax.random.normal(kgs, (T, B, G), dtype=jnp.float32)
    h_T, c_T = recurrent_core_forward_sequence(features_seq, h_prev, c_prev,
                                               gaze_seq, prepared)
    jax.block_until_ready((h_T, c_T))

    h_r, c_r = h_prev, c_prev
    for t in range(T):
        x_t = jnp.concatenate([features_seq[t], gaze_seq[t]], axis=1)
        h_r, c_r = _lstm_cell_reference(x_t, h_r, c_r, w_ih, w_hh, b_ih, b_hh)
    assert jnp.allclose(h_T, h_r, atol=1e-4, rtol=1e-4)
    assert jnp.allclose(c_T, c_r, atol=1e-4, rtol=1e-4)

    print("KERNEL_OK")
</pallas_src>

<mosaic_0001>
module attributes {stable_mosaic.version = 11 : i64} {
  func.func @lstm_cell_kernel(%arg0: memref<4x64xf32, #tpu.memory_space<vmem>>, %arg1: memref<4x32xf32, #tpu.memory_space<vmem>>, %arg2: memref<64x128xf32, #tpu.memory_space<vmem>>, %arg3: memref<1x128xf32, #tpu.memory_space<vmem>>, %arg4: memref<4x32xf32, #tpu.memory_space<vmem>>, %arg5: memref<4x32xf32, #tpu.memory_space<vmem>>) attributes {dimension_semantics = [], scalar_prefetch = 0 : i64, scratch_operands = 0 : i64, tpu.core_type = #tpu.core_type<tc>} {
    %c0 = arith.constant 0 : index
    %c0_0 = arith.constant 0 : index
    %0 = vector.load %arg0[%c0, %c0_0] : memref<4x64xf32, #tpu.memory_space<vmem>>, vector<4x64xf32>
    %c0_1 = arith.constant 0 : index
    %c0_2 = arith.constant 0 : index
    %1 = vector.load %arg1[%c0_1, %c0_2] : memref<4x32xf32, #tpu.memory_space<vmem>>, vector<4x32xf32>
    %c0_3 = arith.constant 0 : index
    %c0_4 = arith.constant 0 : index
    %2 = vector.load %arg2[%c0_3, %c0_4] : memref<64x128xf32, #tpu.memory_space<vmem>>, vector<64x128xf32>
    %cst = arith.constant dense<0.000000e+00> : vector<4x128xf32>
    %3 = tpu.matmul %0, %2, %cst {dimension_numbers = #tpu.dot_dimension_numbers<[1], [0], [0], [1], [0, 0, 1, 1], [], []>} : vector<4x64xf32>, vector<64x128xf32>, vector<4x128xf32> -> vector<4x128xf32>
    %c0_5 = arith.constant 0 : index
    %c0_6 = arith.constant 0 : index
    %4 = vector.load %arg3[%c0_5, %c0_6] : memref<1x128xf32, #tpu.memory_space<vmem>>, vector<1x128xf32>
    %5 = vector.broadcast %4 : vector<1x128xf32> to vector<4x128xf32>
    %6 = arith.addf %3, %5 : vector<4x128xf32>
    %7 = arith.negf %6 : vector<4x128xf32>
    %8 = math.exp %7 : vector<4x128xf32>
    %cst_7 = arith.constant 1.000000e+00 : f32
    %9 = vector.broadcast %cst_7 : f32 to vector<4x128xf32>
    %10 = arith.addf %9, %8 : vector<4x128xf32>
    %11 = arith.divf %9, %10 : vector<4x128xf32>
    %12 = vector.extract_strided_slice %11 {offsets = [0, 0], sizes = [4, 32], strides = [1, 1]} : vector<4x128xf32> to vector<4x32xf32>
    %13 = vector.extract_strided_slice %11 {offsets = [0, 32], sizes = [4, 32], strides = [1, 1]} : vector<4x128xf32> to vector<4x32xf32>
    %14 = vector.extract_strided_slice %11 {offsets = [0, 96], sizes = [4, 32], strides = [1, 1]} : vector<4x128xf32> to vector<4x32xf32>
    %15 = vector.extract_strided_slice %6 {offsets = [0, 64], sizes = [4, 32], strides = [1, 1]} : vector<4x128xf32> to vector<4x32xf32>
    %16 = math.tanh %15 : vector<4x32xf32>
    %17 = arith.mulf %13, %1 : vector<4x32xf32>
    %18 = arith.mulf %12, %16 : vector<4x32xf32>
    %19 = arith.addf %17, %18 : vector<4x32xf32>
    %20 = math.tanh %19 : vector<4x32xf32>
    %21 = arith.mulf %14, %20 : vector<4x32xf32>
    %c0_8 = arith.constant 0 : index
    %c0_9 = arith.constant 0 : index
    %22 = vector.load %arg4[%c0_8, %c0_9] : memref<4x32xf32, #tpu.memory_space<vmem>>, vector<4x32xf32>
    tpu.vector_store %arg4[%c0_8, %c0_9], %21 {strides = array<i32>} : memref<4x32xf32, #tpu.memory_space<vmem>>, vector<4x32xf32>,
    %c0_10 = arith.constant 0 : index
    %c0_11 = arith.constant 0 : index
    %23 = vector.load %arg5[%c0_10, %c0_11] : memref<4x32xf32, #tpu.memory_space<vmem>>, vector<4x32xf32>
    tpu.vector_store %arg5[%c0_10, %c0_11], %19 {strides = array<i32>} : memref<4x32xf32, #tpu.memory_space<vmem>>, vector<4x32xf32>,
    return
  }
}

</mosaic_0001>

<bundles_post_ra>
// kernel: tpu_custom_call.1
= control target key start
LH: loop header
LB: loop body
LE: loop exit
PB: predicated region body
PF: predicated region fallthrough
CT: control target
= control target key end

     0   :  { %11 = vsyncpa [#allocation3], 0  ;;  %s508_s0 = inlined_call_operand.hbm [shape: f32[4,64], index: 0, kind: input, shape index: {}]   ;;  %s509_s1 = inlined_call_operand.hbm [shape: f32[4,32], index: 1, kind: input, shape index: {}]   ;;  %s510_s2 = inlined_call_operand.hbm [shape: f32[64,128], index: 2, kind: input, shape index: {}]   ;;  %s511_s3 = inlined_call_operand.vmem [shape: f32[1,128], index: 3, kind: input, shape index: {}]   ;;  %s512_s4 = inlined_call_operand.hbm [shape: f32[4,32], index: 4, kind: output, shape index: {0}]   ;;  %s513_s5 = inlined_call_operand.hbm [shape: f32[4,32], index: 5, kind: output, shape index: {1}]  }
   0x1   :  { %12 = vsyncpa [#allocation6], 0 }
   0x2   :  { %13 = vsyncpa [#allocation4], 0 }
   0x3   :  { %14 = vsyncpa [#allocation10], 0  ;;  %s400_s18 = smov [#allocation5]   ;;  %s401_s20 = smov [#allocation2]  }
   0x4   :  { %s31_s19 = sshll.u32 %s400_s18, 4  ;;  %s21_s21 = sshll.u32 %s401_s20, 4  ;;  %s32_s19 = int_to_ptr.vmem [resolvable:$true] %s31_s19  ;;  %s22_s21 = int_to_ptr.vmem [resolvable:$true] %s21_s21 }
   0x5   :  { %s282_s24 = scalar_lea.hbm %s509_s1, 64 }
   0x6   :  { %p283_p0 = scmp.ne.s32.totalorder %s509_s1, %s282_s24  ;;  %p286_p1 = scmp.lt.u32.totalorder %s282_s24, %s509_s1 }
   0x8   :  { %p288_p2 = pnand %p286_p1, %p283_p0 }
   0xa   :  { %291 = shalt.err (!%p288_p2)
}
   0xb   :  { %s292_s29 = scalar_lea.vmem %s32_s19, 64  ;;  %p297_p4 = scmp.lt.s32.totalorder %s32_s19, %s32_s19 }
   0xc   :  { %p293_p3 = scmp.ne.s32.totalorder %s32_s19, %s292_s29  ;;  %p298_p5 = scmp.lt.s32.totalorder %s292_s29, %s292_s29 }
   0xe   :  { %p299_p6 = por %p298_p5, %p297_p4 }
  0x10   :  { %p300_p7 = pnand %p299_p6, %p293_p3 }
  0x12   :  { %303 = shalt.err (!%p300_p7)
}
  0x13   :  { %34 = dma.hbm_to_vmem [thread:$0]  %s509_s1, 64, %s32_s19, [#allocation6]  }
  0x14   :  { %s304_s9 = scalar_lea.hbm %s508_s0, 64 }
  0x15   :  { %p305_p8 = scmp.ne.s32.totalorder %s508_s0, %s304_s9  ;;  %p308_p9 = scmp.lt.u32.totalorder %s304_s9, %s508_s0 }
  0x17   :  { %p310_p10 = pnand %p308_p9, %p305_p8 }
  0x19   :  { %313 = shalt.err (!%p310_p10)
}
  0x1a   :  { %s314_s14 = scalar_lea.vmem %s22_s21, 64  ;;  %p319_p12 = scmp.lt.s32.totalorder %s22_s21, %s22_s21 }
  0x1b   :  { %p315_p11 = scmp.ne.s32.totalorder %s22_s21, %s314_s14  ;;  %p320_p13 = scmp.lt.s32.totalorder %s314_s14, %s314_s14 }
  0x1d   :  { %p321_p0 = por %p320_p13, %p319_p12 }
  0x1f   :  { %p322_p1 = pnand %p321_p0, %p315_p11 }
  0x21   :  { %325 = shalt.err (!%p322_p1)
}
  0x22   :  { %24 = dma.hbm_to_vmem [thread:$0]  %s508_s0, 64, %s22_s21, [#allocation3]  }
  0x23   :  { %s402_s16 = smov [#allocation7]   ;;  %s326_s20 = scalar_lea.hbm %s510_s2, 1024 }
  0x24   :  { %s40_s17 = sshll.u32 %s402_s16, 4  ;;  %p327_p2 = scmp.ne.s32.totalorder %s510_s2, %s326_s20  ;;  %s41_s17 = int_to_ptr.vmem [resolvable:$true] %s40_s17 }
  0x25   :  { %p330_p3 = scmp.lt.u32.totalorder %s326_s20, %s510_s2 }
  0x27   :  { %p332_p4 = pnand %p330_p3, %p327_p2 }
  0x29   :  { %335 = shalt.err (!%p332_p4)
}
  0x2a   :  { %s336_s26 = scalar_lea.vmem %s41_s17, 1024  ;;  %p341_p6 = scmp.lt.s32.totalorder %s41_s17, %s41_s17 }
  0x2b   :  { %p337_p5 = scmp.ne.s32.totalorder %s41_s17, %s336_s26  ;;  %p342_p7 = scmp.lt.s32.totalorder %s336_s26, %s336_s26 }
  0x2d   :  { %p343_p8 = por %p342_p7, %p341_p6 }
  0x2f   :  { %p344_p9 = pnand %p343_p8, %p337_p5 }
  0x31   :  { %347 = shalt.err (!%p344_p9)
}
  0x32   :  { %s403_s0 = smov 128   ;;  %s404_s21 = smov 8  }
  0x33   :  { %46 = dma.hbm_to_vmem [thread:$0]  %s510_s2, 1024, %s41_s17, [#allocation6], %s403_s0, %s403_s0, %s404_s21  }
  0x34   :  { %392 = dma.done.wait [#allocation3], 64  }
  0x35   :  { %393 = vsyncadd [#allocation3], 4294967232 }
  0x36   :  { %394 = dma.done.wait [#allocation6], 1088  }
  0x37   :  { %395 = vsyncadd [#allocation6], 4294966208  ;;  %v405_v0 = vmov 0.0|0.0   ;;  %vm406_vm0 = vmmov 0   ;;  %v407_v1 = vmov 0.0   ;;  %v60_v2 = vld [vmem:[#allocation7] sm:$0xff] }
  0x38   :  { %249 = vmatprep.subr.bf16.mxu0 %v405_v0  ;;  %246 = vmatprep.mubr.msk.f32.mxu0 %vm406_vm0, %v407_v1  ;;  %v61_v3 = vld [vmem:[#allocation7 + $0x8] sm:$0xff]  ;;  %v62_v4 = vld [vmem:[#allocation7 + $0x10] sm:$0xff]  ;;  %v63_v6 = vld [vmem:[#allocation7 + $0x18] sm:$0xff]  ;;  %vm75_vm1 = vcmask 523264   ;;  %s408_s30 = smov 64   ;;  %s409_s6 = smov 32  }
  0x39   :  { %v250_v5 = vpack.c.bf16 %v61_v3, %v60_v2  ;;  %v253_v7 = vpack.c.bf16 %v63_v6, %v62_v4  ;;  %v64_v8 = vld [vmem:[#allocation7 + $0x20] sm:$0xff]  ;;  %v65_v9 = vld [vmem:[#allocation7 + $0x28] sm:$0xff]  ;;  %v66_v11 = vld [vmem:[#allocation7 + $0x30] sm:$0xff]  ;;  %s411_s7 = smov [#allocation9]   ;;  %vm181_vm2 = vcmask 257024  }
  0x3a   :  { %v256_v10 = vpack.c.bf16 %v65_v9, %v64_v8  ;;  %v67_v12 = vld [vmem:[#allocation7 + $0x38] sm:$0xff]  ;;  %s204_s8 = sshll.u32 %s411_s7, 4  ;;  %s205_s8 = int_to_ptr.vmem [resolvable:$true] %s204_s8 }
  0x3b   :  { %251 = vmatpush3.bf16.msra.mxu0 %v250_v5  ;;  %v259_v13 = vpack.c.bf16 %v67_v12, %v66_v11  ;;  %v58_v14 = vld [vmem:[#allocation2] sm:$0xf]  ;;  %v59_v20 = vld [vmem:[#allocation5] sm:$0xf]  ;;  %s348_s9 = scalar_lea.vmem %s205_s8, 64  ;;  %p353_p11 = scmp.lt.s32.totalorder %s205_s8, %s205_s8 }
  0x3c   :  { %252 = vmatprep.subr.bf16.mxu0 %v405_v0  ;;  %v218_v15 = vld [vmem:[%s511_s3] ss:$0 sm:$0xff]  ;;  %s410_s3 = smov 96   ;;  %p349_p10 = scmp.ne.s32.totalorder %s205_s8, %s348_s9 }
  0x3d   :  { %p354_p12 = scmp.lt.s32.totalorder %s348_s9, %s348_s9 }
  0x3f   :  { %254 = vmatpush3.bf16.msra.mxu0 %v253_v7  ;;  %p355_p13 = por %p354_p12, %p353_p11 }
  0x40   :  { %255 = vmatprep.subr.bf16.mxu0 %v405_v0 }
  0x41   :  { %p356_p0 = pnand %p355_p13, %p349_p10 }
  0x43   :  { %257 = vmatpush3.bf16.msra.mxu0 %v256_v10 }
  0x44   :  { %258 = vmatprep.subr.bf16.mxu0 %v405_v0 }
  0x47   :  { %260 = vmatpush3.bf16.msra.mxu0 %v259_v13 }
  0x4a   :  { %247 = vmatmul.mubr.msk.f32.vlgmr.msra.gmra.mrb[0].mxu0 %vm75_vm1, %v58_v14 }
 0x11d   :  { %v145_v16 = vpop.f32.mrb[0].mxu0 }
 0x11e   :  { %v146_v17 = vadd.f32 %v218_v15, %v145_v16  ;;  %v248_v18 = vpop.f32.mrb[1].mxu0 }
 0x120   :  { %274 = vtanh.f32 %v146_v17  ;;  %v220_v21 = vmul.f32 -1.442695, %v146_v17 }
 0x122   :  { %276 = vpow2.f32 %v220_v21 }
 0x12a   :  { %v275_v19 = vpop.eup %274 }
 0x12b   :  { %162 = vrot.lane.b32.xlu0 %v275_v19, %s408_s30 }
 0x12c   :  { %v277_v22 = vpop.eup %276 }
 0x12d   :  { %v152_v23 = vadd.f32 1.0, %v277_v22 }
 0x12f   :  { %157 = vrot.lane.b32.xlu0 %v59_v20, %s409_s6  ;;  %278 = vrcp.f32 %v152_v23 }
 0x139   :  { %v279_v24 = vpop.eup %278 }
 0x19d   :  { %v163_v25 = vpop.permute.xlu0 %162 }
 0x19e   :  { %v165_v26 = vmul.f32 %v279_v24, %v163_v25 }
 0x1a0   :  { %167 = vrot.lane.b32.xlu1 %v165_v26, %s409_s6 }
 0x1a1   :  { %v158_v27 = vpop.permute.xlu0 %157 }
 0x1a2   :  { %v160_v28 = vmul.f32 %v279_v24, %v158_v27 }
 0x212   :  { %v168_v29 = vpop.permute.xlu1 %167 }
 0x213   :  { %v170_v30 = vadd.f32 %v168_v29, %v160_v28 }
 0x215   :  { %280 = vtanh.f32 %v170_v30 }
 0x21f   :  { %v281_v31 = vpop.eup %280 }
 0x220   :  { %173 = vrot.lane.b32.xlu1 %v281_v31, %s408_s30 }
 0x224   :  { %184 = vrot.lane.b32.xlu1 %v170_v30, %s410_s3 }
 0x292   :  { %v174_v32 = vpop.permute.xlu1 %173 }
 0x293   :  { %v176_v33 = vmul.f32 %v279_v24, %v174_v32 }
 0x295   :  { %178 = vrot.lane.b32.xlu0 %v176_v33, %s409_s6 }
 0x296   :  { %v185_v34 = vpop.permute.xlu1 %184 }
 0x297   :  { %187 = vst.msk [vmem:[#allocation9] sm:$0xf] %vm181_vm2, %v185_v34 }
 0x298   :  { %359 = shalt.err (!%p356_p0)
}
 0x299   :  { %s360_s12 = scalar_lea.hbm %s513_s5, 64 }
 0x29a   :  { %p361_p1 = scmp.ne.s32.totalorder %s513_s5, %s360_s12  ;;  %p364_p2 = scmp.lt.u32.totalorder %s360_s12, %s513_s5 }
 0x29c   :  { %p366_p3 = pnand %p364_p2, %p361_p1 }
 0x29e   :  { %369 = shalt.err (!%p366_p3)
}
 0x29f   :  { %207 = dma.vmem_to_hbm [thread:$0]  %s205_s8, 64, %s513_s5, [#allocation10]  }
 0x2a0   :  { %s412_s18 = smov [#allocation8]  }
 0x2a1   :  { %s194_s19 = sshll.u32 %s412_s18, 4  ;;  %s195_s19 = int_to_ptr.vmem [resolvable:$true] %s194_s19 }
 0x2a2   :  { %s370_s20 = scalar_lea.vmem %s195_s19, 64  ;;  %p375_p5 = scmp.lt.s32.totalorder %s195_s19, %s195_s19 }
 0x2a3   :  { %p371_p4 = scmp.ne.s32.totalorder %s195_s19, %s370_s20  ;;  %p376_p6 = scmp.lt.s32.totalorder %s370_s20, %s370_s20 }
 0x2a5   :  { %p377_p7 = por %p376_p6, %p375_p5 }
 0x2a7   :  { %p378_p8 = pnand %p377_p7, %p371_p4 }
 0x307   :  { %v179_v35 = vpop.permute.xlu0 %178 }
 0x308   :  { %182 = vst.msk [vmem:[#allocation8] sm:$0xf] %vm181_vm2, %v179_v35 }
 0x309   :  { %381 = shalt.err (!%p378_p8)
}
 0x30a   :  { %s382_s24 = scalar_lea.hbm %s512_s4, 64 }
 0x30b   :  { %p383_p9 = scmp.ne.s32.totalorder %s512_s4, %s382_s24  ;;  %p386_p10 = scmp.lt.u32.totalorder %s382_s24, %s512_s4 }
 0x30d   :  { %p388_p11 = pnand %p386_p10, %p383_p9 }
 0x30f   :  { %391 = shalt.err (!%p388_p11)
}
 0x310   :  { %197 = dma.vmem_to_hbm [thread:$0]  %s195_s19, 64, %s512_s4, [#allocation4]  }
 0x311   :  { %396 = dma.done.wait [#allocation4], 64  }
 0x312   :  { %397 = vsyncadd [#allocation4], 4294967232 }
 0x313   :  { %398 = dma.done.wait [#allocation10], 64  }
 0x314   :  { %399 = vsyncadd [#allocation10], 4294967232 }
 0x315   :  { %214 = vsyncpa [#allocation3], 1 }
 0x316   :  { %215 = vsyncpa [#allocation6], 1 }
 0x317   :  { %216 = vsyncpa [#allocation4], 1 }
 0x318   :  { %217 = vsyncpa [#allocation10], 1 }

</bundles_post_ra>
